<compile_context>
chip_gen: v5e
topology: v5e:2x2
jax: 0.10.0
libtpu: 0.0.40
codegen_flags: <defaults>
</compile_context>

<pallas_src>
import functools

import jax
import jax.numpy as jnp
from jax.experimental import pallas as pl
from jax.experimental.pallas import tpu as pltpu


def _mlp_kernel(x_ref, w1_ref, b1_ref, w2_ref, b2_ref, o_ref, *,
                add_sigmoid, approx_recip):
    # fc1: (B, In) @ (In, H) -> f32 accumulate on the MXU; bias + ReLU in f32.
    h = jnp.dot(x_ref[...], w1_ref[...], preferred_element_type=jnp.float32)
    h = jnp.maximum(h + b1_ref[...], 0.0)
    # fc2: (B, H) @ (H, OutP) -> f32 accumulate; cast h to the weight dtype
    # (bf16 on the fast path) so the MXU runs at its native rate.
    y = jnp.dot(h.astype(w2_ref.dtype), w2_ref[...],
                preferred_element_type=jnp.float32)
    y = y + b2_ref[...]
    if add_sigmoid:
        e = jnp.exp(-y)                               # EUP
        denom = 1.0 + e
        if approx_recip:
            y = pl.reciprocal(denom, approx=True)     # EUP vrcp; VALU stays free
        else:
            y = 1.0 / denom                           # exact (f32 path)
    o_ref[...] = y.astype(o_ref.dtype)


def network_forward(x, w1, b1, w2, b2, *, add_sigmoid=True,
                    compute_dtype=jnp.bfloat16, block_b=128):
    """Fused Pallas forward pass of the 2-layer MLP.

    x  : (B, In)   float32
    w1 : (In, H)   float32  (transposed PyTorch fc1.weight)
    b1 : (H,)      float32
    w2 : (H, Out)  float32  (transposed PyTorch fc2.weight)
    b2 : (Out,)    float32
    returns (B, Out) float32
    """
    B, In = x.shape
    H = w1.shape[1]
    Out = w2.shape[1]

    # Lane-dense output: pad Out up to a multiple of 128 so the epilogue
    # stores full vregs; the extra columns carry zero weight/bias and are
    # sliced off after the call.
    out_p = pl.cdiv(Out, 128) * 128
    if out_p != Out:
        w2 = jnp.pad(w2, ((0, 0), (0, out_p - Out)))
        b2 = jnp.pad(b2, ((0, out_p - Out),))

    # Biases stay f32 and 2-D (sublane broadcast inside the kernel).
    b1_2d = b1.reshape(1, H).astype(jnp.float32)
    b2_2d = b2.reshape(1, out_p).astype(jnp.float32)

    # MXU operands in compute_dtype (bf16 fast path, also halves weight DMA);
    # accumulation stays f32 via preferred_element_type.
    xc = x.astype(compute_dtype)
    w1c = w1.astype(compute_dtype)
    w2c = w2.astype(compute_dtype)

    kernel = functools.partial(
        _mlp_kernel,
        add_sigmoid=add_sigmoid,
        approx_recip=(compute_dtype != jnp.float32),
    )

    if B <= block_b:
        # Small batch: everything fits in VMEM — grid-less call, full-array
        # blocks, no pipeline machinery or double buffering.
        out = pl.pallas_call(
            kernel,
            out_shape=jax.ShapeDtypeStruct((B, out_p), jnp.float32),
            in_specs=[
                pl.BlockSpec((B, In), lambda: (0, 0)),
                pl.BlockSpec((In, H), lambda: (0, 0)),
                pl.BlockSpec((1, H), lambda: (0, 0)),
                pl.BlockSpec((H, out_p), lambda: (0, 0)),
                pl.BlockSpec((1, out_p), lambda: (0, 0)),
            ],
            out_specs=pl.BlockSpec((B, out_p), lambda: (0, 0)),
        )(xc, w1c, b1_2d, w2c, b2_2d)
        return out[:, :Out]

    # Large batch: tile over B; weights/biases stay VMEM-resident across the
    # grid; the batch axis is "parallel" (megacore sharding on v7x).
    n_blocks = pl.cdiv(B, block_b)
    b_pad = n_blocks * block_b
    if b_pad != B:
        xc = jnp.pad(xc, ((0, b_pad - B), (0, 0)))

    out = pl.pallas_call(
        kernel,
        out_shape=jax.ShapeDtypeStruct((b_pad, out_p), jnp.float32),
        grid=(n_blocks,),
        in_specs=[
            pl.BlockSpec((block_b, In), lambda i: (i, 0)),
            pl.BlockSpec((In, H), lambda i: (0, 0)),
            pl.BlockSpec((1, H), lambda i: (0, 0)),
            pl.BlockSpec((H, out_p), lambda i: (0, 0)),
            pl.BlockSpec((1, out_p), lambda i: (0, 0)),
        ],
        out_specs=pl.BlockSpec((block_b, out_p), lambda i: (i, 0)),
        compiler_params=pltpu.CompilerParams(
            dimension_semantics=("parallel",),
            # Tiles here are tiny; 32 MiB is safe on v5e/v6e and leaves
            # headroom under v7x's 64 MiB physical VMEM.
            vmem_limit_bytes=32 * 1024 * 1024,
        ),
    )(xc, w1c, b1_2d, w2c, b2_2d)
    return out[:B, :Out]


def xavier_uniform(key, shape):
    """Matches torch.nn.init.xavier_uniform_ for a (fan_out, fan_in) weight,
    but builds the transposed (fan_in, fan_out) array directly."""
    fan_in, fan_out = shape
    limit = (6.0 / (fan_in + fan_out)) ** 0.5
    return jax.random.uniform(key, shape, jnp.float32, -limit, limit)


if __name__ == "__main__":
    # Small shapes consistent with the module: batch=8, input=32, hidden=64, out=16
    B, IN, HID, OUT = 8, 32, 64, 16

    key = jax.random.PRNGKey(0)
    kx, k1, k2, kx2 = jax.random.split(key, 4)

    # Deterministic parameter init (xavier_uniform weights, zero biases),
    # mirroring Network.init_weights_xavier().
    x = jax.random.normal(kx, (B, IN), jnp.float32)
    w1 = xavier_uniform(k1, (IN, HID))          # fc1.weight.T
    b1 = jnp.zeros((HID,), jnp.float32)
    w2 = xavier_uniform(k2, (HID, OUT))         # fc2.weight.T
    b2 = jnp.zeros((OUT,), jnp.float32)

    def ref_fwd(xa, add_sigmoid=True):
        y = jnp.maximum(xa @ w1 + b1, 0.0) @ w2 + b2
        return jax.nn.sigmoid(y) if add_sigmoid else y

    # 1) f32 path (grid-less, exact sigmoid): tight tolerance vs reference.
    out_f32 = jax.block_until_ready(
        network_forward(x, w1, b1, w2, b2, compute_dtype=jnp.float32))
    assert jnp.allclose(out_f32, ref_fwd(x), atol=1e-5, rtol=1e-5), "f32 mismatch"

    # 2) add_sigmoid=False branch.
    out_lin = jax.block_until_ready(
        network_forward(x, w1, b1, w2, b2, add_sigmoid=False,
                        compute_dtype=jnp.float32))
    assert jnp.allclose(out_lin, ref_fwd(x, add_sigmoid=False),
                        atol=1e-5, rtol=1e-5), "no-sigmoid mismatch"

    # 3) bf16 MXU fast path (default): looser tolerance (bf16 operands,
    #    approx reciprocal in the sigmoid).
    out_bf16 = jax.block_until_ready(network_forward(x, w1, b1, w2, b2))
    assert jnp.allclose(out_bf16, ref_fwd(x), atol=3e-2, rtol=0.0), "bf16 mismatch"

    # 4) batched/tiled path: B=200 -> padded to 2 grid steps of 128.
    xb = jax.random.normal(kx2, (200, IN), jnp.float32)
    out_big = jax.block_until_ready(
        network_forward(xb, w1, b1, w2, b2, compute_dtype=jnp.float32))
    assert out_big.shape == (200, OUT)
    assert jnp.allclose(out_big, ref_fwd(xb), atol=1e-5, rtol=1e-5), "tiled mismatch"

    print("KERNEL_OK")
</pallas_src>

<mosaic_0001>
module attributes {stable_mosaic.version = 11 : i64} {
  func.func @_mlp_kernel(%arg0: memref<8x32xf32, #tpu.memory_space<vmem>>, %arg1: memref<32x64xf32, #tpu.memory_space<vmem>>, %arg2: memref<1x64xf32, #tpu.memory_space<vmem>>, %arg3: memref<64x128xf32, #tpu.memory_space<vmem>>, %arg4: memref<1x128xf32, #tpu.memory_space<vmem>>, %arg5: memref<8x128xf32, #tpu.memory_space<vmem>>) attributes {dimension_semantics = [], scalar_prefetch = 0 : i64, scratch_operands = 0 : i64, tpu.core_type = #tpu.core_type<tc>} {
    %c0 = arith.constant 0 : index
    %c0_0 = arith.constant 0 : index
    %0 = vector.load %arg0[%c0, %c0_0] : memref<8x32xf32, #tpu.memory_space<vmem>>, vector<8x32xf32>
    %c0_1 = arith.constant 0 : index
    %c0_2 = arith.constant 0 : index
    %1 = vector.load %arg1[%c0_1, %c0_2] : memref<32x64xf32, #tpu.memory_space<vmem>>, vector<32x64xf32>
    %cst = arith.constant dense<0.000000e+00> : vector<8x64xf32>
    %2 = tpu.matmul %0, %1, %cst {dimension_numbers = #tpu.dot_dimension_numbers<[1], [0], [0], [1], [0, 0, 1, 1], [], []>} : vector<8x32xf32>, vector<32x64xf32>, vector<8x64xf32> -> vector<8x64xf32>
    %c0_3 = arith.constant 0 : index
    %c0_4 = arith.constant 0 : index
    %3 = vector.load %arg2[%c0_3, %c0_4] : memref<1x64xf32, #tpu.memory_space<vmem>>, vector<1x64xf32>
    %4 = vector.broadcast %3 : vector<1x64xf32> to vector<8x64xf32>
    %5 = arith.addf %2, %4 : vector<8x64xf32>
    %cst_5 = arith.constant 0.000000e+00 : f32
    %6 = vector.broadcast %cst_5 : f32 to vector<8x64xf32>
    %7 = arith.maximumf %5, %6 : vector<8x64xf32>
    %c0_6 = arith.constant 0 : index
    %c0_7 = arith.constant 0 : index
    %8 = vector.load %arg3[%c0_6, %c0_7] : memref<64x128xf32, #tpu.memory_space<vmem>>, vector<64x128xf32>
    %cst_8 = arith.constant dense<0.000000e+00> : vector<8x128xf32>
    %9 = tpu.matmul %7, %8, %cst_8 {dimension_numbers = #tpu.dot_dimension_numbers<[1], [0], [0], [1], [0, 0, 1, 1], [], []>} : vector<8x64xf32>, vector<64x128xf32>, vector<8x128xf32> -> vector<8x128xf32>
    %c0_9 = arith.constant 0 : index
    %c0_10 = arith.constant 0 : index
    %10 = vector.load %arg4[%c0_9, %c0_10] : memref<1x128xf32, #tpu.memory_space<vmem>>, vector<1x128xf32>
    %11 = vector.broadcast %10 : vector<1x128xf32> to vector<8x128xf32>
    %12 = arith.addf %9, %11 : vector<8x128xf32>
    %cst_11 = arith.constant 0.000000e+00 : f32
    %13 = vector.broadcast %cst_11 : f32 to vector<8x128xf32>
    %14 = arith.subf %13, %12 : vector<8x128xf32>
    %15 = math.exp %14 : vector<8x128xf32>
    %cst_12 = arith.constant 1.000000e+00 : f32
    %16 = vector.broadcast %cst_12 : f32 to vector<8x128xf32>
    %17 = arith.addf %16, %15 : vector<8x128xf32>
    %cst_13 = arith.constant 1.000000e+00 : f32
    %18 = vector.broadcast %cst_13 : f32 to vector<8x128xf32>
    %19 = arith.divf %18, %17 : vector<8x128xf32>
    %c0_14 = arith.constant 0 : index
    %c0_15 = arith.constant 0 : index
    %20 = vector.load %arg5[%c0_14, %c0_15] : memref<8x128xf32, #tpu.memory_space<vmem>>, vector<8x128xf32>
    tpu.vector_store %arg5[%c0_14, %c0_15], %19 {strides = array<i32>} : memref<8x128xf32, #tpu.memory_space<vmem>>, vector<8x128xf32>,
    return
  }
}

</mosaic_0001>

<bundles_post_ra>
// kernel: tpu_custom_call.1
= control target key start
LH: loop header
LB: loop body
LE: loop exit
PB: predicated region body
PF: predicated region fallthrough
CT: control target
= control target key end

     0   :  { %10 = vsyncpa [#allocation3], 0  ;;  %s344_s0 = inlined_call_operand.hbm [shape: f32[8,32], index: 0, kind: input, shape index: {}]   ;;  %s345_s1 = inlined_call_operand.hbm [shape: f32[32,64], index: 1, kind: input, shape index: {}]   ;;  %s346_s2 = inlined_call_operand.vmem [shape: f32[1,64], index: 2, kind: input, shape index: {}]   ;;  %s347_s3 = inlined_call_operand.hbm [shape: f32[64,128], index: 3, kind: input, shape index: {}]   ;;  %s348_s4 = inlined_call_operand.vmem [shape: f32[1,128], index: 4, kind: input, shape index: {}]   ;;  %s349_s5 = inlined_call_operand.hbm [shape: f32[8,128], index: 5, kind: output, shape index: {}]  }
   0x1   :  { %11 = vsyncpa [#allocation6], 0  ;;  %s28_s20 = sshll.u32 %s345_s1, 4  ;;  %s29_s20 = int_to_ptr.hbm [resolvable:$true] %s28_s20 }
   0x2   :  { %12 = vsyncpa [#allocation4], 0  ;;  %s290_s21 = smov [#allocation5]   ;;  %s18_s25 = sshll.u32 %s344_s0, 4  ;;  %s19_s25 = int_to_ptr.hbm [resolvable:$true] %s18_s25 }
   0x3   :  { %s30_s22 = sshll.u32 %s290_s21, 4  ;;  %s291_s26 = smov 128   ;;  %s31_s22 = int_to_ptr.vmem [resolvable:$true] %s30_s22 }
   0x4   :  { %s292_s27 = smov 8   ;;  %s293_s28 = smov [#allocation2]  }
   0x5   :  { %36 = dma.hbm_to_vmem [thread:$0]  %s29_s20, 512, %s31_s22, [#allocation6], %s291_s26, %s291_s26, %s292_s27  }
   0x6   :  { %s20_s29 = sshll.u32 %s293_s28, 4  ;;  %s43_s7 = sshll.u32 %s347_s3, 4  ;;  %s21_s29 = int_to_ptr.vmem [resolvable:$true] %s20_s29  ;;  %s44_s7 = int_to_ptr.hbm [resolvable:$true] %s43_s7 }
   0x7   :  { %23 = dma.hbm_to_vmem [thread:$0]  %s19_s25, 128, %s21_s29, [#allocation3]  }
   0x8   :  { %s294_s1 = smov [#allocation7]  }
   0x9   :  { %s45_s8 = sshll.u32 %s294_s1, 4  ;;  %s46_s8 = int_to_ptr.vmem [resolvable:$true] %s45_s8 }
   0xa   :  { %51 = dma.hbm_to_vmem [thread:$0]  %s44_s7, 1024, %s46_s8, [#allocation6], %s291_s26, %s291_s26, %s292_s27  }
   0xb   :  { %284 = dma.done.wait [#allocation3], 128  }
   0xc   :  { %285 = vsyncadd [#allocation3], 4294967168 }
   0xd   :  { %286 = dma.done.wait [#allocation6], 1536  }
   0xe   :  { %287 = vsyncadd [#allocation6], 4294965760  ;;  %v70_v0 = vld [vmem:[#allocation5 + $0x18] sm:$0xff]  ;;  %v69_v1 = vld [vmem:[#allocation5 + $0x10] sm:$0xff]  ;;  %vm75_vm0 = vcmask 261120   ;;  %vm112_vm1 = vcmask 523264  }
   0xf   :  { %91 = vmatpush.msra.mxu0 %v70_v0  ;;  %v107_v2 = vld [vmem:[#allocation7 + $0x38] sm:$0xff]  ;;  %v68_v3 = vld [vmem:[#allocation5 + $0x8] sm:$0xff]  ;;  %v106_v4 = vld [vmem:[#allocation7 + $0x30] sm:$0xff] }
  0x10   :  { %124 = vmatpush.msra.mxu1 %v107_v2  ;;  %v105_v5 = vld [vmem:[#allocation7 + $0x28] sm:$0xff]  ;;  %v67_v6 = vld [vmem:[#allocation5] sm:$0xff]  ;;  %v66_v7 = vld [vmem:[#allocation2] sm:$0xff] }
  0x11   :  { %92 = vmatpush.msra.mxu0 %v69_v1  ;;  %v104_v8 = vld [vmem:[#allocation7 + $0x20] sm:$0xff]  ;;  %v103_v9 = vld [vmem:[#allocation7 + $0x18] sm:$0xff]  ;;  %v102_v10 = vld [vmem:[#allocation7 + $0x10] sm:$0xff] }
  0x12   :  { %125 = vmatpush.msra.mxu1 %v106_v4  ;;  %v101_v11 = vld [vmem:[#allocation7 + $0x8] sm:$0xff]  ;;  %v100_v12 = vld [vmem:[#allocation7] sm:$0xff]  ;;  %v182_v13 = vld [vmem:[%s346_s2] ss:$0 sm:$0xff]  ;;  %s295_s2 = smov [#allocation8]  }
  0x13   :  { %93 = vmatpush.msra.mxu0 %v68_v3  ;;  %v183_v17 = vld [vmem:[%s348_s4] ss:$0 sm:$0xff]  ;;  %s161_s11 = sshll.u32 %s295_s2, 4  ;;  %s163_s4 = sshll.u32 %s349_s5, 4  ;;  %s162_s11 = int_to_ptr.vmem [resolvable:$true] %s161_s11  ;;  %s164_s4 = int_to_ptr.hbm [resolvable:$true] %s163_s4 }
  0x14   :  { %126 = vmatpush.msra.mxu1 %v105_v5 }
  0x15   :  { %94 = vmatpush.msra.mxu0 %v67_v6 }
  0x16   :  { %174 = vmatmul.msk.f32.vlgmr.msra.gmra.mxu0 %vm75_vm0, %v66_v7  ;;  %127 = vmatpush.msra.mxu1 %v104_v8 }
  0x18   :  { %128 = vmatpush.msra.mxu1 %v103_v9 }
  0x1a   :  { %129 = vmatpush.msra.mxu1 %v102_v10 }
  0x1c   :  { %130 = vmatpush.msra.mxu1 %v101_v11 }
  0x1e   :  { %131 = vmatpush.msra.mxu1 %v100_v12 }
  0x93   :  { %v96_v14 = vpop.f32.mrf.mxu0 }
  0x94   :  { %v97_v15 = vadd.f32 %v182_v13, %v96_v14 }
  0x96   :  { %v99_v16 = vmax.f32 %v97_v15, 0.0 }
  0x98   :  { %175 = vmatmul.msk.f32.vlgmr.msra.gmra.mxu1 %vm112_vm1, %v99_v16 }
 0x115   :  { %v133_v18 = vpop.f32.mrf.mxu1 }
 0x116   :  { %v134_v19 = vadd.f32 %v183_v17, %v133_v18 }
 0x118   :  { %v136_v20 = vsub.f32 0.0, %v134_v19 }
 0x11a   :  { %v137_v21 = vmul.f32 1.442695, %v136_v20 }
 0x11c   :  { %184 = vpow2.f32 %v137_v21 }
 0x122   :  { %v185_v22 = vpop.eup %184 }
 0x123   :  { %v139_v23 = vadd.f32 1.0, %v185_v22 }
 0x125   :  { %186 = vrcp.f32 %v139_v23  ;;  %v151_v27 = vand.u32 2147483648, %v139_v23  ;;  %v149_v29 = vand.u32 2147483647, %v139_v23  ;;  %vm145_vm3 = vweird.f32 %v139_v23 }
 0x127   :  { %v152_v31 = vor.u32 1.1754944e-38, %v151_v27  ;;  %vm150_vm5 = vcmp.eq.f32.partialorder %v149_v29, 8.507059e+37 }
 0x12b   :  { %v187_v24 = vpop.eup %186 }
 0x12c   :  { %v141_v25 = vmul.f32 %v187_v24, %v139_v23  ;;  %vm146_vm2 = vweird.f32 %v187_v24 }
 0x12d   :  { %vm147_vm4 = vmor %vm145_vm3, %vm146_vm2 }
 0x12e   :  { %v142_v26 = vsub.f32 1.0, %v141_v25 }
 0x130   :  { %v143_v28 = vmul.f32 %v187_v24, %v142_v26 }
 0x132   :  { %v144_v30 = vadd.f32 %v187_v24, %v143_v28 }
 0x134   :  { %v148_v32 = vsel %vm147_vm4, %v187_v24, %v144_v30 }
 0x135   :  { %v153_v33 = vsel %vm150_vm5, %v152_v31, %v148_v32 }
 0x136   :  { %155 = vst [vmem:[#allocation8] sm:$0xff] %v153_v33 }
 0x137   :  { %166 = dma.vmem_to_hbm [thread:$0]  %s162_s11, 128, %s164_s4, [#allocation4]  }
 0x138   :  { %288 = dma.done.wait [#allocation4], 128  }
 0x139   :  { %289 = vsyncadd [#allocation4], 4294967168 }
 0x13a   :  { %171 = vsyncpa [#allocation3], 1 }
 0x13b   :  { %172 = vsyncpa [#allocation6], 1 }
 0x13c   :  { %173 = vsyncpa [#allocation4], 1 }

</bundles_post_ra>
